<compile_context>
chip_gen: v6e
topology: v6e:2x2x1
jax: 0.10.0
libtpu: 0.0.40
codegen_flags: <defaults>
</compile_context>

<pallas_src>
import functools

import jax
import jax.numpy as jnp
import numpy as np
from jax.experimental import pallas as pl
from jax.experimental.pallas import tpu as pltpu


def attention_kernel(inp_ref, ctxf_ref, mask_ref,
                     wi_ref, bi_ref, wc_ref, bc_ref, v_ref,
                     hid_ref, alpha_ref, attn_ref):
    TB, S = mask_ref.shape
    Hp = wi_ref.shape[1]

    x = inp_ref[...]                              # (TB, D)
    ctx = ctxf_ref[...]                           # (TB*S, D)  flattened rows
    masked = mask_ref[...] != 0                   # (TB, S) bool

    # input_linear: (TB, D) @ (D, Hp) + bi         (MXU, fp32 accumulate)
    proj_x = jnp.dot(x, wi_ref[...],
                     preferred_element_type=jnp.float32) + bi_ref[...]       # (TB, Hp)
    # context_linear (1x1 conv) as ONE matmul: (TB*S, D) @ (D, Hp) + bc
    ctx_h = jnp.dot(ctx, wc_ref[...],
                    preferred_element_type=jnp.float32) + bc_ref[...]        # (TB*S, Hp)
    ctx_h3 = ctx_h.reshape(TB, S, Hp)             # leading-dim split (free when S % 8 == 0)

    # tanh(inp + ctx); proj_x broadcasts over the S positions of each row.
    t = jnp.tanh(ctx_h3 + proj_x[:, None, :])                                # (TB, S, Hp)

    # att[b, s] = sum_h V[h] * t[b, s, h].  VPU multiply + XLU lane reduce
    # (MXU / EUP slots stay free); padded Hp columns of V are zero.
    att = jnp.sum(t * v_ref[...].reshape(1, 1, Hp), axis=-1)                 # (TB, S)

    # Unmasked softmax (attn).
    m_all = jnp.max(att, axis=-1, keepdims=True)
    e_all = jnp.exp(att - m_all)
    attn = e_all / jnp.sum(e_all, axis=-1, keepdims=True)

    # Masked softmax (alpha): -inf masking with the max over *kept* logits,
    # numerically robust (all-masked rows give NaN, same as the reference).
    att_m = jnp.where(masked, -jnp.inf, att)
    m_keep = jnp.max(att_m, axis=-1, keepdims=True)
    e_keep = jnp.exp(att_m - m_keep)
    alpha = e_keep / jnp.sum(e_keep, axis=-1, keepdims=True)

    # hidden[b, h] = sum_s ctx_h[b, s, h] * alpha[b, s]  (batched MXU matmul).
    hidden = jnp.einsum('bqs,bsh->bqh', alpha[:, None, :], ctx_h3,
                        preferred_element_type=jnp.float32)[:, 0, :]         # (TB, Hp)

    hid_ref[...] = hidden.astype(hid_ref.dtype)
    alpha_ref[...] = alpha.astype(alpha_ref.dtype)
    attn_ref[...] = attn.astype(attn_ref.dtype)


def _round_up(x, m):
    return ((x + m - 1) // m) * m


def attention_forward(inp, ctx, mask, wi, bi, wc, bc, v, *,
                      matmul_dtype=jnp.float32, tb_max=64):
    """inp (B,D), ctx (B,S,D), mask (B,S); wi/wc (H,D), bi/bc/v (H,)."""
    B, S, D = ctx.shape
    H = wi.shape[0]
    Hp = _round_up(H, 128)          # lane-dense hidden dim (MXU cols / unmasked vst)
    f32 = jnp.float32

    # Grid-invariant params: pre-transposed to (D, Hp); padded along H only
    # (zero padding contributes exactly 0 to att / hidden).  D is NOT padded.
    wi_t = jnp.zeros((D, Hp), f32).at[:, :H].set(wi.T.astype(f32)).astype(matmul_dtype)
    wc_t = jnp.zeros((D, Hp), f32).at[:, :H].set(wc.T.astype(f32)).astype(matmul_dtype)
    bi2 = jnp.zeros((1, Hp), f32).at[0, :H].set(bi.astype(f32))
    bc2 = jnp.zeros((1, Hp), f32).at[0, :H].set(bc.astype(f32))
    v2 = jnp.zeros((1, Hp), f32).at[0, :H].set(v.astype(f32))

    # Batch tile: TB rows per grid step.  TB == B (full-dim blocks, any B) when
    # B is small; otherwise a multiple of 8 (sublane constraint on 2-D blocks)
    # with the batch padded by benign rows (mask == 0 -> no NaN), sliced below.
    if B <= tb_max:
        TB, Bp = B, B
    else:
        TB = _round_up(tb_max, 8)
        Bp = _round_up(B, TB)

    inp_x = inp.astype(matmul_dtype)
    ctx_x = ctx.astype(matmul_dtype)
    mask_x = mask.astype(jnp.int32)
    if Bp != B:
        pad = Bp - B
        inp_x = jnp.concatenate([inp_x, jnp.zeros((pad, D), inp_x.dtype)], axis=0)
        ctx_x = jnp.concatenate([ctx_x, jnp.zeros((pad, S, D), ctx_x.dtype)], axis=0)
        mask_x = jnp.concatenate([mask_x, jnp.zeros((pad, S), jnp.int32)], axis=0)
    ctx_flat = ctx_x.reshape(Bp * S, D)     # metadata-only reshape (row-major contiguous)

    grid = (Bp // TB,)

    in_specs = [
        pl.BlockSpec((TB, D), lambda b: (b, 0)),          # input h
        pl.BlockSpec((TB * S, D), lambda b: (b, 0)),      # context, flattened rows
        pl.BlockSpec((TB, S), lambda b: (b, 0)),          # mask
        # Grid-invariant parameters (constant index_map).
        # TODO(synk): pipeline_mode=pl.Buffered(1) here for large D/H to halve
        #             their VMEM footprint (negligible at these sizes).
        pl.BlockSpec((D, Hp), lambda b: (0, 0)),          # wi^T
        pl.BlockSpec((1, Hp), lambda b: (0, 0)),          # bi
        pl.BlockSpec((D, Hp), lambda b: (0, 0)),          # wc^T
        pl.BlockSpec((1, Hp), lambda b: (0, 0)),          # bc
        pl.BlockSpec((1, Hp), lambda b: (0, 0)),          # V
    ]
    out_specs = (
        pl.BlockSpec((TB, Hp), lambda b: (b, 0)),         # hidden_state
        pl.BlockSpec((TB, S), lambda b: (b, 0)),          # alpha
        pl.BlockSpec((TB, S), lambda b: (b, 0)),          # attn
    )
    out_shape = (
        jax.ShapeDtypeStruct((Bp, Hp), jnp.float32),
        jax.ShapeDtypeStruct((Bp, S), jnp.float32),
        jax.ShapeDtypeStruct((Bp, S), jnp.float32),
    )

    itemsize = jnp.dtype(matmul_dtype).itemsize
    cost = pl.CostEstimate(
        flops=int(2 * Bp * S * D * Hp + 2 * Bp * D * Hp + 4 * Bp * S * Hp),
        transcendentals=int(Bp * S * Hp + 2 * Bp * S),
        bytes_accessed=int(Bp * S * D * itemsize + Bp * D * itemsize
                           + 2 * D * Hp * itemsize + 3 * Hp * 4
                           + Bp * Hp * 4 + 3 * Bp * S * 4),
    )
    compiler_params = pltpu.CompilerParams(
        dimension_semantics=("parallel",),   # batch steps independent -> megacore sharding
        # Explicit (v5e's scoped default is only 16 MiB); stays under v7x's
        # 64 MiB physical VMEM.  Can be raised toward ~96 MiB on v6e if TB grows.
        vmem_limit_bytes=48 * 1024 * 1024,
    )

    hid, alpha, attn = pl.pallas_call(
        attention_kernel,
        out_shape=out_shape,
        grid=grid,
        in_specs=in_specs,
        out_specs=out_specs,
        compiler_params=compiler_params,
        cost_estimate=cost,
    )(inp_x, ctx_flat, mask_x, wi_t, bi2, wc_t, bc2, v2)

    return hid[:B, :H], alpha[:B], attn[:B]


def reference_forward(inp, ctx, mask, wi, bi, wc, bc, v):
    proj_x = inp @ wi.T + bi
    ctx_h = jnp.einsum('bsd,hd->bsh', ctx, wc) + bc
    t = jnp.tanh(ctx_h + proj_x[:, None, :])
    att = jnp.einsum('bsh,h->bs', t, v)
    attn = jax.nn.softmax(att, axis=-1)
    alpha = jax.nn.softmax(jnp.where(mask != 0, -jnp.inf, att), axis=-1)
    hidden = jnp.einsum('bsh,bs->bh', ctx_h, alpha)
    return hidden, alpha, attn


if __name__ == "__main__":
    B, S = 2, 8           # batch, sequence length
    D, H = 16, 32         # input_dim, hidden_dim

    key = jax.random.PRNGKey(0)
    k_in, k_ctx, k_msk, k_wi, k_bi, k_wc, k_bc, k_v = jax.random.split(key, 8)

    inp = jax.random.normal(k_in, (B, D), jnp.float32)
    ctx = jax.random.normal(k_ctx, (B, S, D), jnp.float32)
    mask = (jax.random.uniform(k_msk, (B, S)) < 0.3).astype(jnp.int32)
    mask = mask.at[:, 0].set(0)   # keep at least one unmasked position per row

    # Same parameter shapes as nn.Linear / 1x1 nn.Conv1d / V ~ U(-1, 1).
    wi = jax.random.uniform(k_wi, (H, D), jnp.float32, -0.1, 0.1)
    bi = jax.random.uniform(k_bi, (H,), jnp.float32, -0.1, 0.1)
    wc = jax.random.uniform(k_wc, (H, D), jnp.float32, -0.1, 0.1)
    bc = jax.random.uniform(k_bc, (H,), jnp.float32, -0.1, 0.1)
    v = jax.random.uniform(k_v, (H,), jnp.float32, -1.0, 1.0)

    # 1) fp32-operand path, single-step grid (TB == B) — matches module precision.
    hidden, alpha, attn = jax.jit(attention_forward)(inp, ctx, mask, wi, bi, wc, bc, v)
    jax.block_until_ready((hidden, alpha, attn))
    r_hidden, r_alpha, r_attn = reference_forward(inp, ctx, mask, wi, bi, wc, bc, v)
    np.testing.assert_allclose(np.asarray(hidden), np.asarray(r_hidden), atol=1e-5, rtol=1e-5)
    np.testing.assert_allclose(np.asarray(alpha), np.asarray(r_alpha), atol=1e-5, rtol=1e-5)
    np.testing.assert_allclose(np.asarray(attn), np.asarray(r_attn), atol=1e-5, rtol=1e-5)

    # 2) Batched-grid path: B2 > tb_max so TB=8, batch padded to 24, grid=(3,).
    B2 = 20
    k2 = jax.random.split(jax.random.PRNGKey(1), 3)
    inp2 = jax.random.normal(k2[0], (B2, D), jnp.float32)
    ctx2 = jax.random.normal(k2[1], (B2, S, D), jnp.float32)
    mask2 = (jax.random.uniform(k2[2], (B2, S)) < 0.3).astype(jnp.int32)
    mask2 = mask2.at[:, 0].set(0)
    fwd_tiled = jax.jit(functools.partial(attention_forward, tb_max=8))
    h2, a2, t2 = fwd_tiled(inp2, ctx2, mask2, wi, bi, wc, bc, v)
    jax.block_until_ready((h2, a2, t2))
    rh2, ra2, rt2 = reference_forward(inp2, ctx2, mask2, wi, bi, wc, bc, v)
    np.testing.assert_allclose(np.asarray(h2), np.asarray(rh2), atol=1e-5, rtol=1e-5)
    np.testing.assert_allclose(np.asarray(a2), np.asarray(ra2), atol=1e-5, rtol=1e-5)
    np.testing.assert_allclose(np.asarray(t2), np.asarray(rt2), atol=1e-5, rtol=1e-5)

    # 3) bf16-operand path (bf16 MXU on v5e/v6e/v7x, half the ctx DMA); loose check.
    bf16_fwd = jax.jit(functools.partial(attention_forward, matmul_dtype=jnp.bfloat16))
    h16, a16, t16 = bf16_fwd(inp, ctx, mask, wi, bi, wc, bc, v)
    jax.block_until_ready((h16, a16, t16))
    np.testing.assert_allclose(np.asarray(h16), np.asarray(r_hidden), atol=5e-2, rtol=5e-2)
    np.testing.assert_allclose(np.asarray(a16), np.asarray(r_alpha), atol=5e-2, rtol=5e-2)

    print("KERNEL_OK")
</pallas_src>

<mosaic_0001>
module attributes {stable_mosaic.version = 11 : i64} {
  func.func @attention_kernel(%arg0: i32, %arg1: memref<2x16xf32, #tpu.memory_space<vmem>>, %arg2: memref<16x16xf32, #tpu.memory_space<vmem>>, %arg3: memref<2x8xi32, #tpu.memory_space<vmem>>, %arg4: memref<16x128xf32, #tpu.memory_space<vmem>>, %arg5: memref<1x128xf32, #tpu.memory_space<vmem>>, %arg6: memref<16x128xf32, #tpu.memory_space<vmem>>, %arg7: memref<1x128xf32, #tpu.memory_space<vmem>>, %arg8: memref<1x128xf32, #tpu.memory_space<vmem>>, %arg9: memref<2x128xf32, #tpu.memory_space<vmem>>, %arg10: memref<2x8xf32, #tpu.memory_space<vmem>>, %arg11: memref<2x8xf32, #tpu.memory_space<vmem>>) attributes {dimension_semantics = [#tpu.dimension_semantics<parallel>], iteration_bounds = array<i64: 1>, scalar_prefetch = 0 : i64, scratch_operands = 0 : i64, tpu.core_type = #tpu.core_type<tc>, window_params = [{transform_indices = @transform_0, window_bounds = array<i64: 2, 16>}, {transform_indices = @transform_1, window_bounds = array<i64: 16, 16>}, {transform_indices = @transform_2, window_bounds = array<i64: 2, 8>}, {pipeline_mode = #tpu.pipeline_mode<synchronous>, transform_indices = @transform_3, window_bounds = array<i64: 16, 128>}, {pipeline_mode = #tpu.pipeline_mode<synchronous>, transform_indices = @transform_4, window_bounds = array<i64: 1, 128>}, {pipeline_mode = #tpu.pipeline_mode<synchronous>, transform_indices = @transform_5, window_bounds = array<i64: 16, 128>}, {pipeline_mode = #tpu.pipeline_mode<synchronous>, transform_indices = @transform_6, window_bounds = array<i64: 1, 128>}, {pipeline_mode = #tpu.pipeline_mode<synchronous>, transform_indices = @transform_7, window_bounds = array<i64: 1, 128>}, {transform_indices = @transform_8, window_bounds = array<i64: 2, 128>}, {transform_indices = @transform_9, window_bounds = array<i64: 2, 8>}, {transform_indices = @transform_10, window_bounds = array<i64: 2, 8>}]} {
    %c0 = arith.constant 0 : index
    %c0_0 = arith.constant 0 : index
    %0 = vector.load %arg1[%c0, %c0_0] : memref<2x16xf32, #tpu.memory_space<vmem>>, vector<2x16xf32>
    %c0_1 = arith.constant 0 : index
    %c0_2 = arith.constant 0 : index
    %1 = vector.load %arg2[%c0_1, %c0_2] : memref<16x16xf32, #tpu.memory_space<vmem>>, vector<16x16xf32>
    %c0_3 = arith.constant 0 : index
    %c0_4 = arith.constant 0 : index
    %2 = vector.load %arg3[%c0_3, %c0_4] : memref<2x8xi32, #tpu.memory_space<vmem>>, vector<2x8xi32>
    %c0_i32 = arith.constant 0 : i32
    %3 = vector.broadcast %c0_i32 : i32 to vector<2x8xi32>
    %4 = arith.cmpi ne, %2, %3 : vector<2x8xi32>
    %c0_5 = arith.constant 0 : index
    %c0_6 = arith.constant 0 : index
    %5 = vector.load %arg4[%c0_5, %c0_6] : memref<16x128xf32, #tpu.memory_space<vmem>>, vector<16x128xf32>
    %cst = arith.constant dense<0.000000e+00> : vector<2x128xf32>
    %6 = tpu.matmul %0, %5, %cst {dimension_numbers = #tpu.dot_dimension_numbers<[1], [0], [0], [1], [0, 0, 1, 1], [], []>} : vector<2x16xf32>, vector<16x128xf32>, vector<2x128xf32> -> vector<2x128xf32>
    %c0_7 = arith.constant 0 : index
    %c0_8 = arith.constant 0 : index
    %7 = vector.load %arg5[%c0_7, %c0_8] : memref<1x128xf32, #tpu.memory_space<vmem>>, vector<1x128xf32>
    %8 = vector.broadcast %7 : vector<1x128xf32> to vector<2x128xf32>
    %9 = arith.addf %6, %8 : vector<2x128xf32>
    %c0_9 = arith.constant 0 : index
    %c0_10 = arith.constant 0 : index
    %10 = vector.load %arg6[%c0_9, %c0_10] : memref<16x128xf32, #tpu.memory_space<vmem>>, vector<16x128xf32>
    %cst_11 = arith.constant dense<0.000000e+00> : vector<16x128xf32>
    %11 = tpu.matmul %1, %10, %cst_11 {dimension_numbers = #tpu.dot_dimension_numbers<[1], [0], [0], [1], [0, 0, 1, 1], [], []>} : vector<16x16xf32>, vector<16x128xf32>, vector<16x128xf32> -> vector<16x128xf32>
    %c0_12 = arith.constant 0 : index
    %c0_13 = arith.constant 0 : index
    %12 = vector.load %arg7[%c0_12, %c0_13] : memref<1x128xf32, #tpu.memory_space<vmem>>, vector<1x128xf32>
    %13 = vector.broadcast %12 : vector<1x128xf32> to vector<16x128xf32>
    %14 = arith.addf %11, %13 : vector<16x128xf32>
    %15 = vector.shape_cast %14 : vector<16x128xf32> to vector<2x8x128xf32>
    %16 = vector.shape_cast %9 : vector<2x128xf32> to vector<2x1x128xf32>
    %17 = vector.broadcast %16 : vector<2x1x128xf32> to vector<2x8x128xf32>
    %18 = arith.addf %15, %17 : vector<2x8x128xf32>
    %19 = math.tanh %18 : vector<2x8x128xf32>
    %c0_14 = arith.constant 0 : index
    %c0_15 = arith.constant 0 : index
    %20 = vector.load %arg8[%c0_14, %c0_15] : memref<1x128xf32, #tpu.memory_space<vmem>>, vector<1x128xf32>
    %21 = vector.shape_cast %20 : vector<1x128xf32> to vector<1x1x128xf32>
    %22 = vector.broadcast %21 : vector<1x1x128xf32> to vector<2x8x128xf32>
    %23 = arith.mulf %19, %22 : vector<2x8x128xf32>
    %cst_16 = arith.constant dense<0.000000e+00> : vector<2x8xf32>
    %24 = vector.multi_reduction <add>, %23, %cst_16 [2] : vector<2x8x128xf32> to vector<2x8xf32>
    %cst_17 = arith.constant dense<0xFF800000> : vector<2xf32>
    %25 = vector.multi_reduction <maximumf>, %24, %cst_17 [1] : vector<2x8xf32> to vector<2xf32>
    %26 = vector.shape_cast %25 : vector<2xf32> to vector<2x1xf32>
    %27 = vector.broadcast %26 : vector<2x1xf32> to vector<2x8xf32>
    %28 = arith.subf %24, %27 : vector<2x8xf32>
    %29 = math.exp %28 : vector<2x8xf32>
    %cst_18 = arith.constant dense<0.000000e+00> : vector<2xf32>
    %30 = vector.multi_reduction <add>, %29, %cst_18 [1] : vector<2x8xf32> to vector<2xf32>
    %31 = vector.shape_cast %30 : vector<2xf32> to vector<2x1xf32>
    %32 = vector.broadcast %31 : vector<2x1xf32> to vector<2x8xf32>
    %33 = arith.divf %29, %32 : vector<2x8xf32>
    %cst_19 = arith.constant 0xFF800000 : f32
    %34 = vector.broadcast %cst_19 : f32 to vector<2x8xf32>
    %35 = arith.select %4, %34, %24 : vector<2x8xi1>, vector<2x8xf32>
    %cst_20 = arith.constant dense<0xFF800000> : vector<2xf32>
    %36 = vector.multi_reduction <maximumf>, %35, %cst_20 [1] : vector<2x8xf32> to vector<2xf32>
    %37 = vector.shape_cast %36 : vector<2xf32> to vector<2x1xf32>
    %38 = vector.broadcast %37 : vector<2x1xf32> to vector<2x8xf32>
    %39 = arith.subf %35, %38 : vector<2x8xf32>
    %40 = math.exp %39 : vector<2x8xf32>
    %cst_21 = arith.constant dense<0.000000e+00> : vector<2xf32>
    %41 = vector.multi_reduction <add>, %40, %cst_21 [1] : vector<2x8xf32> to vector<2xf32>
    %42 = vector.shape_cast %41 : vector<2xf32> to vector<2x1xf32>
    %43 = vector.broadcast %42 : vector<2x1xf32> to vector<2x8xf32>
    %44 = arith.divf %40, %43 : vector<2x8xf32>
    %45 = vector.shape_cast %44 : vector<2x8xf32> to vector<2x1x8xf32>
    "tpu.trace_start"() <{level = 10 : i32, message = "bqs,bsh->bqh"}> : () -> ()
    %cst_22 = arith.constant dense<0.000000e+00> : vector<2x1x128xf32>
    %46 = tpu.matmul %45, %15, %cst_22 {dimension_numbers = #tpu.dot_dimension_numbers<[2], [1], [1], [2], [0, 0, 0, 1, 1, 2], [0], [0]>} : vector<2x1x8xf32>, vector<2x8x128xf32>, vector<2x1x128xf32> -> vector<2x1x128xf32>
    "tpu.trace_stop"() : () -> ()
    %47 = vector.shape_cast %46 : vector<2x1x128xf32> to vector<2x128xf32>
    %c0_23 = arith.constant 0 : index
    %c0_24 = arith.constant 0 : index
    %48 = vector.load %arg9[%c0_23, %c0_24] : memref<2x128xf32, #tpu.memory_space<vmem>>, vector<2x128xf32>
    tpu.vector_store %arg9[%c0_23, %c0_24], %47 {strides = array<i32>} : memref<2x128xf32, #tpu.memory_space<vmem>>, vector<2x128xf32>,
    %c0_25 = arith.constant 0 : index
    %c0_26 = arith.constant 0 : index
    %49 = vector.load %arg10[%c0_25, %c0_26] : memref<2x8xf32, #tpu.memory_space<vmem>>, vector<2x8xf32>
    tpu.vector_store %arg10[%c0_25, %c0_26], %44 {strides = array<i32>} : memref<2x8xf32, #tpu.memory_space<vmem>>, vector<2x8xf32>,
    %c0_27 = arith.constant 0 : index
    %c0_28 = arith.constant 0 : index
    %50 = vector.load %arg11[%c0_27, %c0_28] : memref<2x8xf32, #tpu.memory_space<vmem>>, vector<2x8xf32>
    tpu.vector_store %arg11[%c0_27, %c0_28], %33 {strides = array<i32>} : memref<2x8xf32, #tpu.memory_space<vmem>>, vector<2x8xf32>,
    return
  }
  func.func @transform_0(%arg0: i32) -> (i32, i32) {
    %c0_i32 = arith.constant 0 : i32
    %c0_i32_0 = arith.constant 0 : i32
    return %arg0, %c0_i32 : i32, i32
  }
  func.func @transform_1(%arg0: i32) -> (i32, i32) {
    %c0_i32 = arith.constant 0 : i32
    %c0_i32_0 = arith.constant 0 : i32
    return %arg0, %c0_i32 : i32, i32
  }
  func.func @transform_2(%arg0: i32) -> (i32, i32) {
    %c0_i32 = arith.constant 0 : i32
    %c0_i32_0 = arith.constant 0 : i32
    return %arg0, %c0_i32 : i32, i32
  }
  func.func @transform_3(%arg0: i32) -> (i32, i32) {
    %c0_i32 = arith.constant 0 : i32
    %c0_i32_0 = arith.constant 0 : i32
    %c0_i32_1 = arith.constant 0 : i32
    return %c0_i32, %c0_i32_0 : i32, i32
  }
  func.func @transform_4(%arg0: i32) -> (i32, i32) {
    %c0_i32 = arith.constant 0 : i32
    %c0_i32_0 = arith.constant 0 : i32
    %c0_i32_1 = arith.constant 0 : i32
    return %c0_i32, %c0_i32_0 : i32, i32
  }
  func.func @transform_5(%arg0: i32) -> (i32, i32) {
    %c0_i32 = arith.constant 0 : i32
    %c0_i32_0 = arith.constant 0 : i32
    %c0_i32_1 = arith.constant 0 : i32
    return %c0_i32, %c0_i32_0 : i32, i32
  }
  func.func @transform_6(%arg0: i32) -> (i32, i32) {
    %c0_i32 = arith.constant 0 : i32
    %c0_i32_0 = arith.constant 0 : i32
    %c0_i32_1 = arith.constant 0 : i32
    return %c0_i32, %c0_i32_0 : i32, i32
  }
  func.func @transform_7(%arg0: i32) -> (i32, i32) {
    %c0_i32 = arith.constant 0 : i32
    %c0_i32_0 = arith.constant 0 : i32
    %c0_i32_1 = arith.constant 0 : i32
    return %c0_i32, %c0_i32_0 : i32, i32
  }
  func.func @transform_8(%arg0: i32) -> (i32, i32) {
    %c0_i32 = arith.constant 0 : i32
    %c0_i32_0 = arith.constant 0 : i32
    return %arg0, %c0_i32 : i32, i32
  }
  func.func @transform_9(%arg0: i32) -> (i32, i32) {
    %c0_i32 = arith.constant 0 : i32
    %c0_i32_0 = arith.constant 0 : i32
    return %arg0, %c0_i32 : i32, i32
  }
  func.func @transform_10(%arg0: i32) -> (i32, i32) {
    %c0_i32 = arith.constant 0 : i32
    %c0_i32_0 = arith.constant 0 : i32
    return %arg0, %c0_i32 : i32, i32
  }
}

</mosaic_0001>

<bundles_post_ra>
// kernel: attention_forward.1
= control target key start
LH: loop header
LB: loop body
LE: loop exit
PB: predicated region body
PF: predicated region fallthrough
CT: control target
= control target key end

     0   :  { %16 = vsyncpa [#allocation3], 0  ;;  %v713_v2 = vmov 0.0   ;;  %vm714_vm0 = vmmov 0   ;;  %vm48_vm1 = vcmask 130048   ;;  %s858_s0 = inlined_call_operand.vmem [shape: f32[2,16], index: 0, kind: input, shape index: {}]   ;;  %s859_s1 = inlined_call_operand.vmem [shape: f32[16,16], index: 1, kind: input, shape index: {}]   ;;  %s860_s2 = inlined_call_operand.vmem [shape: s32[2,8], index: 2, kind: input, shape index: {}]   ;;  %s861_s3 = inlined_call_operand.vmem [shape: f32[16,128], index: 3, kind: input, shape index: {}]   ;;  %s862_s4 = inlined_call_operand.vmem [shape: f32[1,128], index: 4, kind: input, shape index: {}]   ;;  %s863_s5 = inlined_call_operand.vmem [shape: f32[16,128], index: 5, kind: input, shape index: {}]   ;;  %s864_s6 = inlined_call_operand.vmem [shape: f32[1,128], index: 6, kind: input, shape index: {}]   ;;  %s865_s7 = inlined_call_operand.vmem [shape: f32[1,128], index: 7, kind: input, shape index: {}]   ;;  %s866_s8 = inlined_call_operand.hbm [shape: f32[2,128], index: 8, kind: output, shape index: {0}]   ;;  %s867_s9 = inlined_call_operand.hbm [shape: f32[2,8], index: 9, kind: output, shape index: {1}]   ;;  %s868_s10 = inlined_call_operand.hbm [shape: f32[2,8], index: 10, kind: output, shape index: {2}]  }
   0x1   :  { %v40_v0 = vld [vmem:[%s861_s3 + $0x8] sm:$0xff]  ;;  %600 = vmatprep.subr.mxu0 %v713_v2  ;;  %v39_v3 = vld [vmem:[%s861_s3] sm:$0xff]  ;;  %604 = vmatprep.mubr.msk.f32.mxu0 %vm714_vm0, %v713_v2 }
   0x2   :  { %v123_v1 = vld [vmem:[%s863_s5 + $0x8] sm:$0xff]  ;;  %v122_v4 = vld [vmem:[%s863_s5] sm:$0xff]  ;;  %601 = vmatpush3.msra.mxu0 %v40_v0 }
   0x3   :  { %607 = vmatprep.subr.mxu1 %v123_v1  ;;  %v34_v5 = vld [vmem:[%s858_s0] sm:$0x3] }
   0x4   :  { %17 = vsyncpa [#allocation5], 0  ;;  %602 = vmatprep.subr.mxu0 %v713_v2  ;;  %608 = vmatpush3.msra.mxu1 %v123_v1  ;;  %v35_v6 = vld [vmem:[%s859_s1] sm:$0xff]  ;;  %v36_v7 = vld [vmem:[%s859_s1 + $0x8] sm:$0xff]  ;;  %v715_v8 = vmov 1966171168   ;;  %v216_v10 = vlaneseq }
   0x5   :  { %603 = vmatpush3.msra.mxu0 %v39_v3  ;;  %609 = vmatprep.subr.mxu1 %v122_v4  ;;  %v214_v9 = vunpack.c.l.s4 %v715_v8  ;;  %v581_v13 = vld [vmem:[%s862_s4] ss:$0 sm:$0xff]  ;;  %vm274_vm2 = vcmask 1041409   ;;  %vm277_vm4 = vcmask 58368   ;;  %v716_v48 = vmov 0  }
   0x6   :  { %605 = vmatmul.mubr.msk.f32.vlgmr.msra.gmra.mxu0 %vm48_vm1, %v34_v5  ;;  %610 = vmatpush3.msra.mxu1 %v122_v4  ;;  %v799_v12 = vshrl.u32 %v216_v10, 7  ;;  %v583_v16 = vld [vmem:[%s864_s6] ss:$0 sm:$0xff]  ;;  %v265_v37 = vand.u32 127, %v216_v10  ;;  %vm369_vm5 = vcmask 64512  }
   0x7   :  { %611 = vmatprep.mubr.msk.f32.mxu1 %vm48_vm1, %v35_v6  ;;  %614 = vmatprep.subr.mxu0 %v713_v2  ;;  %v215_v11 = vunpack.c.0.s8 %v214_v9  ;;  %v586_v32 = vld [vmem:[%s865_s7] ss:$0 sm:$0xff] }
   0x8   :  { %612 = vmatmul.mubr.msk.f32.vlgmr.msra.gmra.mxu1 %vm48_vm1, %v36_v7  ;;  %619 = vmatprep.subr.mxu1 %v713_v2  ;;  %v812_v22 = vsub.s32 0, %v799_v12  ;;  %v822_v39 = vsub.s32 %v265_v37, %v799_v12  ;;  %v37_v40 = vld [vmem:[%s860_s2] sm:$0x3]  ;;  %v288_v56 = vsub.s32 1, %v799_v12  ;;  %s717_s2 = smov [#allocation4]  }
   0x9   :  { %616 = vmatprep.mubr.msk.f32.mxu0 %vm714_vm0, %v713_v2  ;;  %621 = vmatprep.mubr.msk.f32.mxu1 %vm714_vm0, %v713_v2  ;;  %v805_v14 = vsub.s32 %v215_v11, %v799_v12  ;;  %vm38_vm3 = vcmp.ne.s32.totalorder %v37_v40, 0  ;;  %s556_s7 = sshll.u32 %s717_s2, 4  ;;  %s557_s7 = int_to_ptr.vmem [resolvable:$true] %s556_s7 }
   0xa   :  { %631 = vset.pattern.permute.xlu1 %v716_v48  ;;  %632 = vset.pattern.permute.xlu0 %v716_v48  ;;  %s649_s29 = scalar_lea.vmem %s557_s7, 32  ;;  %p654_p1 = scmp.lt.s32.totalorder %s557_s7, %s557_s7 }
   0xb   :  { %p650_p0 = scmp.ne.s32.totalorder %s557_s7, %s649_s29  ;;  %p655_p2 = scmp.lt.s32.totalorder %s649_s29, %s649_s29 }
   0xd   :  { %p656_p3 = por %p655_p2, %p654_p1 }
   0xf   :  { %p657_p4 = pnand %p656_p3, %p650_p0 }
  0xc6   :  { %v118_v15 = vpop.f32.mrf.mxu0 }
  0xc7   :  { %v119_v17 = vadd.f32 %v581_v13, %v118_v15 }
  0xc8   :  { %v606_v18 = vpop.f32.mrf.mxu0  ;;  %v613_v19 = vpop.f32.mrf.mxu1 }
  0xc9   :  { %v219_v20 = vrot.slane %v119_v17, %v805_v14  ;;  %v209_v21 = vadd.f32 %v613_v19, %v583_v16 }
  0xca   :  { %v203_v23 = vpop.f32.mrf.mxu1 }
  0xcb   :  { %v220_v24 = vcombine.high %v219_v20, %v219_v20  ;;  %v227_v25 = vrot.slane %v219_v20, %v805_v14  ;;  %v204_v26 = vadd.f32 %v583_v16, %v203_v23  ;;  %620 = vmatpush3.msra.mxu1 %v209_v21 }
  0xcd   :  { %v234_v27 = vrot.slane %v220_v24, %v805_v14  ;;  %v238_v28 = vrot.slane %v227_v25, %v812_v22  ;;  %615 = vmatpush3.msra.mxu0 %v204_v26 }
  0xcf   :  { %v242_v29 = vrot.slane %v234_v27, %v812_v22  ;;  %v245_v30 = vadd.f32 %v238_v28, %v204_v26 }
  0xd1   :  { %v246_v31 = vadd.f32 %v242_v29, %v209_v21  ;;  %633 = vtanh.f32 %v245_v30 }
  0xd3   :  { %635 = vtanh.f32 %v246_v31 }
  0xde   :  { %v634_v33 = vpop.eup %633 }
  0xdf   :  { %v256_v34 = vmul.f32 %v634_v33, %v586_v32 }
  0xe0   :  { %v636_v35 = vpop.eup %635 }
  0xe1   :  { %258 = vadd.xlane.f32.xlu0 %v256_v34  ;;  %v257_v36 = vmul.f32 %v636_v35, %v586_v32 }
  0xe5   :  { %260 = vadd.xlane.f32.xlu0 %v257_v36 }
 0x16a   :  { %v259_v38 = vpop.xlane.xlu0 %258 }
 0x16b   :  { %v269_v42 = vrot.slane %v259_v38, %v822_v39 }
 0x16e   :  { %v261_v41 = vpop.xlane.xlu0 %260 }
 0x16f   :  { %v273_v43 = vrot.slane %v261_v41, %v822_v39 }
 0x171   :  { %v275_v44 = vsel %vm274_vm2, %v273_v43, %v269_v42 }
 0x172   :  { %v334_v45 = vsel %vm38_vm3, -inf, %v275_v44  ;;  %v278_v47 = vsel %vm277_vm4, %v275_v44, -inf }
 0x173   :  { %v335_v46 = vsel %vm277_vm4, %v334_v45, -inf }
 0x174   :  { %336 = vmax.xlane.f32.xlu1 %v335_v46 }
 0x178   :  { %279 = vmax.xlane.f32.xlu1 %v278_v47 }
 0x1fd   :  { %v337_v49 = vpop.xlane.xlu1 %336 }
 0x1fe   :  { %v338_v50 = vsub.f32 %v334_v45, %v337_v49 }
 0x200   :  { %v339_v51 = vmul.f32 1.442695, %v338_v50 }
 0x201   :  { %v280_v52 = vpop.xlane.xlu1 %279 }
 0x202   :  { %637 = vpow2.f32 %v339_v51  ;;  %v285_v53 = vrot.slane %v280_v52, %v812_v22  ;;  %v289_v57 = vrot.slane %v280_v52, %v288_v56 }
 0x204   :  { %v292_v54 = vsub.f32 %v259_v38, %v285_v53  ;;  %v293_v60 = vsub.f32 %v261_v41, %v289_v57 }
 0x206   :  { %v294_v55 = vmul.f32 1.442695, %v292_v54  ;;  %v296_v62 = vmul.f32 1.442695, %v293_v60 }
 0x208   :  { %639 = vpow2.f32 %v294_v55 }
 0x209   :  { %641 = vpow2.f32 %v296_v62 }
 0x20f   :  { %v638_v58 = vpop.eup %637 }
 0x210   :  { %v341_v59 = vsel %vm277_vm4, %v638_v58, 0.0 }
 0x211   :  { %342 = vadd.xlane.f32.xlu0 %v341_v59 }
 0x215   :  { %v640_v61 = vpop.eup %639 }
 0x216   :  { %301 = vperm.xlu1 %631, %v640_v61   ;;  %v642_v63 = vpop.eup %641 }
 0x227   :  { %304 = vperm.xlu0 %632, %v642_v63  }
 0x291   :  { %v302_v1 = vpop.permute.xlu1 %301 }
 0x292   :  { %v309_v3 = vrot.slane %v302_v1, %v822_v39 }
 0x29a   :  { %v343_v0 = vpop.xlane.xlu0 %342 }
 0x29b   :  { %643 = vrcp.f32 %v343_v0 }
 0x2a2   :  { %v305_v2 = vpop.permute.xlu0 %304 }
 0x2a3   :  { %v313_v4 = vrot.slane %v305_v2, %v822_v39 }
 0x2a5   :  { %v314_v5 = vsel %vm274_vm2, %v313_v4, %v309_v3 }
 0x2a6   :  { %v316_v6 = vsel %vm277_vm4, %v314_v5, 0.0 }
 0x2a7   :  { %317 = vadd.xlane.f32.xlu1 %v316_v6 }
 0x2a8   :  { %v644_v7 = vpop.eup %643 }
 0x2a9   :  { %v345_v8 = vmul.f32 %v644_v7, %v638_v58 }
 0x2ab   :  { %520 = vst.msk [vmem:[#allocation4] sm:$0x3] %vm277_vm4, %v345_v8  ;;  %v353_v9 = vrot.slane %v345_v8, %v805_v14 }
 0x2ad   :  { %v361_v10 = vrot.slane %v353_v9, %v805_v14  ;;  %v354_v11 = vcombine.high %v353_v9, %v353_v9 }
 0x2af   :  { %617 = vmatmul.mubr.msk.f32.vlgmr.msra.gmra.mxu0 %vm369_vm5, %v361_v10  ;;  %v368_v12 = vrot.slane %v354_v11, %v805_v14 }
 0x2b1   :  { %622 = vmatmul.mubr.msk.f32.vlgmr.msra.gmra.mxu1 %vm369_vm5, %v368_v12 }
 0x330   :  { %v318_v13 = vpop.xlane.xlu1 %317 }
 0x331   :  { %v323_v15 = vrot.slane %v318_v13, %v812_v22  ;;  %v327_v16 = vrot.slane %v318_v13, %v288_v56 }
 0x333   :  { %645 = vrcp.f32 %v323_v15 }
 0x334   :  { %647 = vrcp.f32 %v327_v16 }
 0x340   :  { %v646_v17 = vpop.eup %645 }
 0x341   :  { %v331_v18 = vmul.f32 %v646_v17, %v640_v61  ;;  %v648_v19 = vpop.eup %647 }
 0x342   :  { %v333_v20 = vmul.f32 %v648_v19, %v642_v63 }
 0x343   :  { %524 = vperm.xlu0 %632, %v331_v18  }
 0x344   :  { %660 = shalt.err (!%p657_p4)
}
 0x345   :  { %559 = dma.vmem_to_hbm [thread:$0]  %s557_s7, 32, %s867_s9, [#allocation5]  }
 0x346   :  { %s718_s12 = smov [#allocation2]  }
 0x347   :  { %527 = vperm.xlu0 %632, %v333_v20   ;;  %s546_s13 = sshll.u32 %s718_s12, 4  ;;  %s547_s13 = int_to_ptr.vmem [resolvable:$true] %s546_s13 }
 0x348   :  { %s669_s14 = scalar_lea.vmem %s547_s13, 32  ;;  %p674_p6 = scmp.lt.s32.totalorder %s547_s13, %s547_s13 }
 0x349   :  { %p670_p5 = scmp.ne.s32.totalorder %s547_s13, %s669_s14  ;;  %p675_p7 = scmp.lt.s32.totalorder %s669_s14, %s669_s14 }
 0x34b   :  { %p676_p8 = por %p675_p7, %p674_p6 }
 0x34d   :  { %p677_p9 = pnand %p676_p8, %p670_p5 }
 0x36f   :  { %v438_v14 = vpop.f32.mrf.mxu0 }
 0x371   :  { %v618_v21 = vpop.f32.mrf.mxu0  ;;  %v510_v22 = vpop.f32.mrf.mxu1 }
 0x372   :  { %v516_v23 = vrot.slane %v510_v22, 7 }
 0x373   :  { %v623_v24 = vpop.f32.mrf.mxu1 }
 0x374   :  { %v517_v25 = vsel %vm274_vm2, %v516_v23, %v438_v14 }
 0x375   :  { %519 = vst [vmem:[#allocation2] sm:$0x3] %v517_v25 }
 0x376   :  { %680 = shalt.err (!%p677_p9)
}
 0x377   :  { %549 = dma.vmem_to_hbm [thread:$0]  %s547_s13, 32, %s866_s8, [#allocation3]  }
 0x378   :  { %s719_s16 = smov [#allocation6]  }
 0x379   :  { %s566_s17 = sshll.u32 %s719_s16, 4  ;;  %s567_s17 = int_to_ptr.vmem [resolvable:$true] %s566_s17 }
 0x37a   :  { %s689_s18 = scalar_lea.vmem %s567_s17, 32  ;;  %p694_p11 = scmp.lt.s32.totalorder %s567_s17, %s567_s17 }
 0x37b   :  { %p690_p10 = scmp.ne.s32.totalorder %s567_s17, %s689_s18  ;;  %p695_p12 = scmp.lt.s32.totalorder %s689_s18, %s689_s18 }
 0x37d   :  { %p696_p13 = por %p695_p12, %p694_p11 }
 0x37f   :  { %p697_p0 = pnand %p696_p13, %p690_p10 }
 0x3be   :  { %v525_v26 = vpop.permute.xlu0 %524 }
 0x3bf   :  { %v532_v28 = vrot.slane %v525_v26, %v822_v39 }
 0x3c2   :  { %v528_v27 = vpop.permute.xlu0 %527 }
 0x3c3   :  { %v536_v29 = vrot.slane %v528_v27, %v822_v39 }
 0x3c5   :  { %v537_v30 = vsel %vm274_vm2, %v536_v29, %v532_v28 }
 0x3c6   :  { %539 = vst.msk [vmem:[#allocation6] sm:$0x3] %vm277_vm4, %v537_v30 }
 0x3c7   :  { %700 = shalt.err (!%p697_p0)
}
 0x3c8   :  { %569 = dma.vmem_to_hbm [thread:$0]  %s567_s17, 32, %s868_s10, [#allocation5]  }
 0x3c9   :  { %709 = dma.done.wait [#allocation3], 32  }
 0x3ca   :  { %710 = vsyncadd [#allocation3], 4294967264 }
 0x3cb   :  { %711 = dma.done.wait [#allocation5], 64  }
 0x3cc   :  { %712 = vsyncadd [#allocation5], 4294967232 }
 0x3cd   :  { %579 = vsyncpa [#allocation3], 1 }
 0x3ce   :  { %580 = vsyncpa [#allocation5], 1 }

</bundles_post_ra>
